<compile_context>
chip_gen: v7x
topology: tpu7x:2x2x1
jax: 0.10.0
libtpu: 0.0.40
codegen_flags: <defaults>
</compile_context>

<pallas_src>
import jax
import jax.numpy as jnp
from jax.experimental import pallas as pl
from jax.experimental.pallas import tpu as pltpu


def _make_kernel(num_heads, q_tile):
    H = num_heads

    def kernel(xkv_ref, xq_ref,
               wq_ref, bq_ref, wk_ref, bk_ref, wv_ref, bv_ref, wo_ref, bo_ref,
               o_ref, q_sc, k_sc, v_sc):
        qi = pl.program_id(1)

        # --- K/V projections: once per batch element, cached in VMEM scratch
        #     that persists across the query-tile grid axis.  Heads come from
        #     leading-axis indexing of the weight refs (free), so there is no
        #     lane slicing of activations.
        @pl.when(qi == 0)
        def _():
            x = xkv_ref[0]                                   # (N, C)
            for h in range(H):
                k_sc[h] = (jnp.dot(x, wk_ref[h],
                                   preferred_element_type=jnp.float32)
                           + bk_ref[h]).astype(k_sc.dtype)
                v_sc[h] = (jnp.dot(x, wv_ref[h],
                                   preferred_element_type=jnp.float32)
                           + bv_ref[h]).astype(v_sc.dtype)

        # --- Q projection for this query tile (softmax scale pre-folded into
        #     wq / bq on the host, so no extra VPU scaling pass).
        xq = xq_ref[0]                                       # (q_tile, C)
        for h in range(H):
            q_sc[h] = (jnp.dot(xq, wq_ref[h],
                               preferred_element_type=jnp.float32)
                       + bq_ref[h]).astype(q_sc.dtype)

        q = q_sc[...]                                        # (H, q_tile, D)
        k = k_sc[...]                                        # (H, N, D)
        v = v_sc[...]                                        # (H, N, D)

        # --- Head-batched attention: single dot_generals over all heads keep
        #     the MXU pipelined instead of H tiny matmuls + lane concatenate.
        s = jnp.einsum("htd,hnd->htn", q, k,
                       preferred_element_type=jnp.float32)   # (H, q_tile, N)
        s = s - jnp.max(s, axis=-1, keepdims=True)
        p = jnp.exp(s)
        # pl.reciprocal(approx=True) would move this onto the idle EUP slot;
        # kept exact here to hold the 1e-4 reference tolerance.
        p = p * pl.reciprocal(jnp.sum(p, axis=-1, keepdims=True))

        o_heads = jnp.einsum("htn,hnd->htd", p.astype(v.dtype), v,
                             preferred_element_type=jnp.float32)  # (H, q_tile, D)

        # --- Output projection: per-head partial products summed over heads
        #     (== concat(heads) @ Wo.T, without the lane concatenate).
        y = jnp.einsum("htd,hdc->htc", o_heads, wo_ref[...],
                       preferred_element_type=jnp.float32)
        y = jnp.sum(y, axis=0) + bo_ref[...]                 # (q_tile, C)
        o_ref[0] = y.astype(o_ref.dtype)

    return kernel


def linear_attention(x, params, num_heads, *, q_tile=None):
    """x: (B, N, C); params: PyTorch-layout weights (out, in) and biases (C,)."""
    B, N, C = x.shape
    H = num_heads
    assert C % H == 0, "hidden_size must be divisible by num_heads"
    D = C // H
    scale = D ** (-0.5)

    if q_tile is None:
        q_tile = next((t for t in (256, 128) if N % t == 0), N)
    assert N % q_tile == 0
    nq = N // q_tile

    # Host-side weight prep (free at trace time): transpose to (in, out), split
    # heads onto a leading batch axis, fold the softmax scale into Q.
    def split_heads(w):                 # (C_out, C_in) -> (H, C_in, D)
        return jnp.swapaxes(w.reshape(H, D, C), 1, 2)

    wq = split_heads(params["wq"]) * scale
    bq = (params["bq"] * scale).reshape(H, 1, D)
    wk = split_heads(params["wk"])
    bk = params["bk"].reshape(H, 1, D)
    wv = split_heads(params["wv"])
    bv = params["bv"].reshape(H, 1, D)
    wo = params["wo"].T.reshape(H, D, C)     # per-head (D, C) rows of Wo.T
    bo = params["bo"].reshape(1, C)

    def const_map(b, qi):
        return (0, 0, 0)

    w_spec = pl.BlockSpec((H, C, D), const_map)
    b_spec = pl.BlockSpec((H, 1, D), const_map)
    # NOTE: weight index_maps are grid-invariant; on VMEM-tight targets (v7x,
    # 64 MiB) they could additionally be single-buffered (pl.Buffered(1)).

    # Size scoped VMEM from the actual working set, with headroom.
    p_item = jnp.dtype(params["wq"].dtype).itemsize
    x_item = jnp.dtype(x.dtype).itemsize
    est = (2 * 4 * C * C * p_item                    # double-buffered weights
           + 2 * (N + q_tile) * C * x_item           # x blocks (kv + q tile)
           + 2 * q_tile * C * x_item                 # output block
           + (2 * N + q_tile) * C * x_item           # k/v/q VMEM scratch
           + 6 * H * q_tile * N * 4)                 # softmax intermediates
    vmem_limit = int(min(112 * 2 ** 20, max(32 * 2 ** 20, 2 * est)))

    return pl.pallas_call(
        _make_kernel(H, q_tile),
        out_shape=jax.ShapeDtypeStruct((B, N, C), x.dtype),
        grid_spec=pltpu.PrefetchScalarGridSpec(
            num_scalar_prefetch=0,
            grid=(B, nq),
            in_specs=[
                pl.BlockSpec((1, N, C), lambda b, qi: (b, 0, 0)),        # x (K/V)
                pl.BlockSpec((1, q_tile, C), lambda b, qi: (b, qi, 0)),  # x (Q tile)
                w_spec, b_spec,                                          # q_proj
                w_spec, b_spec,                                          # k_proj
                w_spec, b_spec,                                          # v_proj
                pl.BlockSpec((H, D, C), const_map),                      # out_proj W
                pl.BlockSpec((1, C), lambda b, qi: (0, 0)),              # out_proj b
            ],
            out_specs=pl.BlockSpec((1, q_tile, C), lambda b, qi: (b, qi, 0)),
            scratch_shapes=[
                pltpu.VMEM((H, q_tile, D), x.dtype),   # Q (per query tile)
                pltpu.VMEM((H, N, D), x.dtype),        # K cache (per batch)
                pltpu.VMEM((H, N, D), x.dtype),        # V cache (per batch)
            ],
        ),
        compiler_params=pltpu.CompilerParams(
            dimension_semantics=("parallel", "arbitrary"),
            vmem_limit_bytes=vmem_limit,
        ),
    )(x, x, wq, bq, wk, bk, wv, bv, wo, bo)


def _reference(x, params, num_heads):
    """Pure-JAX reference mirroring the PyTorch forward exactly."""
    B, N, C = x.shape
    D = C // num_heads
    scale = D ** (-0.5)

    def lin(t, w, b):
        return jnp.einsum("bnc,oc->bno", t, w) + b

    q = lin(x, params["wq"], params["bq"]).reshape(B, N, num_heads, D)
    k = lin(x, params["wk"], params["bk"]).reshape(B, N, num_heads, D)
    v = lin(x, params["wv"], params["bv"]).reshape(B, N, num_heads, D)
    q = jnp.transpose(q, (0, 2, 1, 3)) * scale
    k = jnp.transpose(k, (0, 2, 1, 3))
    v = jnp.transpose(v, (0, 2, 1, 3))
    attn = jnp.einsum("bhqd,bhkd->bhqk", q, k)
    attn = jax.nn.softmax(attn, axis=-1)
    out = jnp.einsum("bhqk,bhkd->bhqd", attn, v)
    out = jnp.transpose(out, (0, 2, 1, 3)).reshape(B, N, C)
    return lin(out, params["wo"], params["bo"])


def _init_params(key, hidden_size):
    """Deterministic init, PyTorch nn.Linear-style uniform(-1/sqrt(C), 1/sqrt(C))."""
    bound = 1.0 / (hidden_size ** 0.5)
    keys = jax.random.split(key, 8)
    names = ["wq", "bq", "wk", "bk", "wv", "bv", "wo", "bo"]
    params = {}
    for i, name in enumerate(names):
        shape = (hidden_size, hidden_size) if name.startswith("w") else (hidden_size,)
        params[name] = jax.random.uniform(
            keys[i], shape, minval=-bound, maxval=bound, dtype=jnp.float32)
    return params


if __name__ == "__main__":
    B, N, C = 2, 8, 32
    num_heads = 4

    key = jax.random.PRNGKey(0)
    kx, kp = jax.random.split(key)
    x = jax.random.normal(kx, (B, N, C), dtype=jnp.float32)
    params = _init_params(kp, C)

    out = linear_attention(x, params, num_heads)
    out = jax.block_until_ready(out)

    ref = _reference(x, params, num_heads)
    assert out.shape == (B, N, C)
    assert jnp.allclose(out, ref, atol=1e-4, rtol=1e-4), "mismatch vs reference"

    print("KERNEL_OK")
</pallas_src>

<mosaic_0001>
module attributes {stable_mosaic.version = 11 : i64} {
  func.func @kernel(%arg0: i32, %arg1: i32, %arg2: memref<1x8x32xf32, #tpu.memory_space<vmem>>, %arg3: memref<1x8x32xf32, #tpu.memory_space<vmem>>, %arg4: memref<4x32x8xf32, #tpu.memory_space<vmem>>, %arg5: memref<4x1x8xf32, #tpu.memory_space<vmem>>, %arg6: memref<4x32x8xf32, #tpu.memory_space<vmem>>, %arg7: memref<4x1x8xf32, #tpu.memory_space<vmem>>, %arg8: memref<4x32x8xf32, #tpu.memory_space<vmem>>, %arg9: memref<4x1x8xf32, #tpu.memory_space<vmem>>, %arg10: memref<4x8x32xf32, #tpu.memory_space<vmem>>, %arg11: memref<1x32xf32, #tpu.memory_space<vmem>>, %arg12: memref<1x8x32xf32, #tpu.memory_space<vmem>>, %arg13: memref<4x8x8xf32, #tpu.memory_space<vmem>>, %arg14: memref<4x8x8xf32, #tpu.memory_space<vmem>>, %arg15: memref<4x8x8xf32, #tpu.memory_space<vmem>>) attributes {dimension_semantics = [#tpu.dimension_semantics<parallel>, #tpu.dimension_semantics<arbitrary>], iteration_bounds = array<i64: 2, 1>, scalar_prefetch = 0 : i64, scratch_operands = 3 : i64, tpu.core_type = #tpu.core_type<tc>, window_params = [{transform_indices = @transform_0, window_bounds = array<i64: 1, 8, 32>}, {transform_indices = @transform_1, window_bounds = array<i64: 1, 8, 32>}, {pipeline_mode = #tpu.pipeline_mode<synchronous>, transform_indices = @transform_2, window_bounds = array<i64: 4, 32, 8>}, {pipeline_mode = #tpu.pipeline_mode<synchronous>, transform_indices = @transform_3, window_bounds = array<i64: 4, 1, 8>}, {pipeline_mode = #tpu.pipeline_mode<synchronous>, transform_indices = @transform_4, window_bounds = array<i64: 4, 32, 8>}, {pipeline_mode = #tpu.pipeline_mode<synchronous>, transform_indices = @transform_5, window_bounds = array<i64: 4, 1, 8>}, {pipeline_mode = #tpu.pipeline_mode<synchronous>, transform_indices = @transform_6, window_bounds = array<i64: 4, 32, 8>}, {pipeline_mode = #tpu.pipeline_mode<synchronous>, transform_indices = @transform_7, window_bounds = array<i64: 4, 1, 8>}, {pipeline_mode = #tpu.pipeline_mode<synchronous>, transform_indices = @transform_8, window_bounds = array<i64: 4, 8, 32>}, {pipeline_mode = #tpu.pipeline_mode<synchronous>, transform_indices = @transform_9, window_bounds = array<i64: 1, 32>}, {transform_indices = @transform_10, window_bounds = array<i64: 1, 8, 32>}]} {
    %c0_i32 = arith.constant 0 : i32
    %0 = arith.cmpi eq, %arg1, %c0_i32 : i32
    %1 = arith.extui %0 : i1 to i32
    %c0_i32_0 = arith.constant 0 : i32
    %2 = arith.cmpi ne, %1, %c0_i32_0 : i32
    scf.if %2 {
      %c0_62 = arith.constant 0 : index
      %c0_63 = arith.constant 0 : index
      %c0_64 = arith.constant 0 : index
      %69 = vector.load %arg2[%c0_62, %c0_63, %c0_64] : memref<1x8x32xf32, #tpu.memory_space<vmem>>, vector<1x8x32xf32>
      %70 = vector.shape_cast %69 : vector<1x8x32xf32> to vector<8x32xf32>
      %c0_65 = arith.constant 0 : index
      %c0_66 = arith.constant 0 : index
      %c0_67 = arith.constant 0 : index
      %71 = vector.load %arg6[%c0_65, %c0_66, %c0_67] : memref<4x32x8xf32, #tpu.memory_space<vmem>>, vector<1x32x8xf32>
      %72 = vector.shape_cast %71 : vector<1x32x8xf32> to vector<32x8xf32>
      %cst_68 = arith.constant dense<0.000000e+00> : vector<8x8xf32>
      %73 = tpu.matmul %70, %72, %cst_68 {dimension_numbers = #tpu.dot_dimension_numbers<[1], [0], [0], [1], [0, 0, 1, 1], [], []>} : vector<8x32xf32>, vector<32x8xf32>, vector<8x8xf32> -> vector<8x8xf32>
      %c0_69 = arith.constant 0 : index
      %c0_70 = arith.constant 0 : index
      %c0_71 = arith.constant 0 : index
      %74 = vector.load %arg7[%c0_69, %c0_70, %c0_71] : memref<4x1x8xf32, #tpu.memory_space<vmem>>, vector<1x1x8xf32>
      %75 = vector.shape_cast %74 : vector<1x1x8xf32> to vector<1x8xf32>
      %76 = vector.broadcast %75 : vector<1x8xf32> to vector<8x8xf32>
      %77 = arith.addf %73, %76 : vector<8x8xf32>
      %c0_72 = arith.constant 0 : index
      %c0_73 = arith.constant 0 : index
      %c0_74 = arith.constant 0 : index
      %78 = vector.load %arg14[%c0_72, %c0_73, %c0_74] : memref<4x8x8xf32, #tpu.memory_space<vmem>>, vector<1x8x8xf32>
      %79 = vector.shape_cast %78 : vector<1x8x8xf32> to vector<8x8xf32>
      %80 = vector.shape_cast %77 : vector<8x8xf32> to vector<1x8x8xf32>
      tpu.vector_store %arg14[%c0_72, %c0_73, %c0_74], %80 {strides = array<i32>} : memref<4x8x8xf32, #tpu.memory_space<vmem>>, vector<1x8x8xf32>,
      %c0_75 = arith.constant 0 : index
      %c0_76 = arith.constant 0 : index
      %c0_77 = arith.constant 0 : index
      %81 = vector.load %arg8[%c0_75, %c0_76, %c0_77] : memref<4x32x8xf32, #tpu.memory_space<vmem>>, vector<1x32x8xf32>
      %82 = vector.shape_cast %81 : vector<1x32x8xf32> to vector<32x8xf32>
      %cst_78 = arith.constant dense<0.000000e+00> : vector<8x8xf32>
      %83 = tpu.matmul %70, %82, %cst_78 {dimension_numbers = #tpu.dot_dimension_numbers<[1], [0], [0], [1], [0, 0, 1, 1], [], []>} : vector<8x32xf32>, vector<32x8xf32>, vector<8x8xf32> -> vector<8x8xf32>
      %c0_79 = arith.constant 0 : index
      %c0_80 = arith.constant 0 : index
      %c0_81 = arith.constant 0 : index
      %84 = vector.load %arg9[%c0_79, %c0_80, %c0_81] : memref<4x1x8xf32, #tpu.memory_space<vmem>>, vector<1x1x8xf32>
      %85 = vector.shape_cast %84 : vector<1x1x8xf32> to vector<1x8xf32>
      %86 = vector.broadcast %85 : vector<1x8xf32> to vector<8x8xf32>
      %87 = arith.addf %83, %86 : vector<8x8xf32>
      %c0_82 = arith.constant 0 : index
      %c0_83 = arith.constant 0 : index
      %c0_84 = arith.constant 0 : index
      %88 = vector.load %arg15[%c0_82, %c0_83, %c0_84] : memref<4x8x8xf32, #tpu.memory_space<vmem>>, vector<1x8x8xf32>
      %89 = vector.shape_cast %88 : vector<1x8x8xf32> to vector<8x8xf32>
      %90 = vector.shape_cast %87 : vector<8x8xf32> to vector<1x8x8xf32>
      tpu.vector_store %arg15[%c0_82, %c0_83, %c0_84], %90 {strides = array<i32>} : memref<4x8x8xf32, #tpu.memory_space<vmem>>, vector<1x8x8xf32>,
      %c1_85 = arith.constant 1 : index
      %c0_86 = arith.constant 0 : index
      %c0_87 = arith.constant 0 : index
      %91 = vector.load %arg6[%c1_85, %c0_86, %c0_87] : memref<4x32x8xf32, #tpu.memory_space<vmem>>, vector<1x32x8xf32>
      %92 = vector.shape_cast %91 : vector<1x32x8xf32> to vector<32x8xf32>
      %cst_88 = arith.constant dense<0.000000e+00> : vector<8x8xf32>
      %93 = tpu.matmul %70, %92, %cst_88 {dimension_numbers = #tpu.dot_dimension_numbers<[1], [0], [0], [1], [0, 0, 1, 1], [], []>} : vector<8x32xf32>, vector<32x8xf32>, vector<8x8xf32> -> vector<8x8xf32>
      %c1_89 = arith.constant 1 : index
      %c0_90 = arith.constant 0 : index
      %c0_91 = arith.constant 0 : index
      %94 = vector.load %arg7[%c1_89, %c0_90, %c0_91] : memref<4x1x8xf32, #tpu.memory_space<vmem>>, vector<1x1x8xf32>
      %95 = vector.shape_cast %94 : vector<1x1x8xf32> to vector<1x8xf32>
      %96 = vector.broadcast %95 : vector<1x8xf32> to vector<8x8xf32>
      %97 = arith.addf %93, %96 : vector<8x8xf32>
      %c1_92 = arith.constant 1 : index
      %c0_93 = arith.constant 0 : index
      %c0_94 = arith.constant 0 : index
      %98 = vector.load %arg14[%c1_92, %c0_93, %c0_94] : memref<4x8x8xf32, #tpu.memory_space<vmem>>, vector<1x8x8xf32>
      %99 = vector.shape_cast %98 : vector<1x8x8xf32> to vector<8x8xf32>
      %100 = vector.shape_cast %97 : vector<8x8xf32> to vector<1x8x8xf32>
      tpu.vector_store %arg14[%c1_92, %c0_93, %c0_94], %100 {strides = array<i32>} : memref<4x8x8xf32, #tpu.memory_space<vmem>>, vector<1x8x8xf32>,
      %c1_95 = arith.constant 1 : index
      %c0_96 = arith.constant 0 : index
      %c0_97 = arith.constant 0 : index
      %101 = vector.load %arg8[%c1_95, %c0_96, %c0_97] : memref<4x32x8xf32, #tpu.memory_space<vmem>>, vector<1x32x8xf32>
      %102 = vector.shape_cast %101 : vector<1x32x8xf32> to vector<32x8xf32>
      %cst_98 = arith.constant dense<0.000000e+00> : vector<8x8xf32>
      %103 = tpu.matmul %70, %102, %cst_98 {dimension_numbers = #tpu.dot_dimension_numbers<[1], [0], [0], [1], [0, 0, 1, 1], [], []>} : vector<8x32xf32>, vector<32x8xf32>, vector<8x8xf32> -> vector<8x8xf32>
      %c1_99 = arith.constant 1 : index
      %c0_100 = arith.constant 0 : index
      %c0_101 = arith.constant 0 : index
      %104 = vector.load %arg9[%c1_99, %c0_100, %c0_101] : memref<4x1x8xf32, #tpu.memory_space<vmem>>, vector<1x1x8xf32>
      %105 = vector.shape_cast %104 : vector<1x1x8xf32> to vector<1x8xf32>
      %106 = vector.broadcast %105 : vector<1x8xf32> to vector<8x8xf32>
      %107 = arith.addf %103, %106 : vector<8x8xf32>
      %c1_102 = arith.constant 1 : index
      %c0_103 = arith.constant 0 : index
      %c0_104 = arith.constant 0 : index
      %108 = vector.load %arg15[%c1_102, %c0_103, %c0_104] : memref<4x8x8xf32, #tpu.memory_space<vmem>>, vector<1x8x8xf32>
      %109 = vector.shape_cast %108 : vector<1x8x8xf32> to vector<8x8xf32>
      %110 = vector.shape_cast %107 : vector<8x8xf32> to vector<1x8x8xf32>
      tpu.vector_store %arg15[%c1_102, %c0_103, %c0_104], %110 {strides = array<i32>} : memref<4x8x8xf32, #tpu.memory_space<vmem>>, vector<1x8x8xf32>,
      %c2_105 = arith.constant 2 : index
      %c0_106 = arith.constant 0 : index
      %c0_107 = arith.constant 0 : index
      %111 = vector.load %arg6[%c2_105, %c0_106, %c0_107] : memref<4x32x8xf32, #tpu.memory_space<vmem>>, vector<1x32x8xf32>
      %112 = vector.shape_cast %111 : vector<1x32x8xf32> to vector<32x8xf32>
      %cst_108 = arith.constant dense<0.000000e+00> : vector<8x8xf32>
      %113 = tpu.matmul %70, %112, %cst_108 {dimension_numbers = #tpu.dot_dimension_numbers<[1], [0], [0], [1], [0, 0, 1, 1], [], []>} : vector<8x32xf32>, vector<32x8xf32>, vector<8x8xf32> -> vector<8x8xf32>
      %c2_109 = arith.constant 2 : index
      %c0_110 = arith.constant 0 : index
      %c0_111 = arith.constant 0 : index
      %114 = vector.load %arg7[%c2_109, %c0_110, %c0_111] : memref<4x1x8xf32, #tpu.memory_space<vmem>>, vector<1x1x8xf32>
      %115 = vector.shape_cast %114 : vector<1x1x8xf32> to vector<1x8xf32>
      %116 = vector.broadcast %115 : vector<1x8xf32> to vector<8x8xf32>
      %117 = arith.addf %113, %116 : vector<8x8xf32>
      %c2_112 = arith.constant 2 : index
      %c0_113 = arith.constant 0 : index
      %c0_114 = arith.constant 0 : index
      %118 = vector.load %arg14[%c2_112, %c0_113, %c0_114] : memref<4x8x8xf32, #tpu.memory_space<vmem>>, vector<1x8x8xf32>
      %119 = vector.shape_cast %118 : vector<1x8x8xf32> to vector<8x8xf32>
      %120 = vector.shape_cast %117 : vector<8x8xf32> to vector<1x8x8xf32>
      tpu.vector_store %arg14[%c2_112, %c0_113, %c0_114], %120 {strides = array<i32>} : memref<4x8x8xf32, #tpu.memory_space<vmem>>, vector<1x8x8xf32>,
      %c2_115 = arith.constant 2 : index
      %c0_116 = arith.constant 0 : index
      %c0_117 = arith.constant 0 : index
      %121 = vector.load %arg8[%c2_115, %c0_116, %c0_117] : memref<4x32x8xf32, #tpu.memory_space<vmem>>, vector<1x32x8xf32>
      %122 = vector.shape_cast %121 : vector<1x32x8xf32> to vector<32x8xf32>
      %cst_118 = arith.constant dense<0.000000e+00> : vector<8x8xf32>
      %123 = tpu.matmul %70, %122, %cst_118 {dimension_numbers = #tpu.dot_dimension_numbers<[1], [0], [0], [1], [0, 0, 1, 1], [], []>} : vector<8x32xf32>, vector<32x8xf32>, vector<8x8xf32> -> vector<8x8xf32>
      %c2_119 = arith.constant 2 : index
      %c0_120 = arith.constant 0 : index
      %c0_121 = arith.constant 0 : index
      %124 = vector.load %arg9[%c2_119, %c0_120, %c0_121] : memref<4x1x8xf32, #tpu.memory_space<vmem>>, vector<1x1x8xf32>
      %125 = vector.shape_cast %124 : vector<1x1x8xf32> to vector<1x8xf32>
      %126 = vector.broadcast %125 : vector<1x8xf32> to vector<8x8xf32>
      %127 = arith.addf %123, %126 : vector<8x8xf32>
      %c2_122 = arith.constant 2 : index
      %c0_123 = arith.constant 0 : index
      %c0_124 = arith.constant 0 : index
      %128 = vector.load %arg15[%c2_122, %c0_123, %c0_124] : memref<4x8x8xf32, #tpu.memory_space<vmem>>, vector<1x8x8xf32>
      %129 = vector.shape_cast %128 : vector<1x8x8xf32> to vector<8x8xf32>
      %130 = vector.shape_cast %127 : vector<8x8xf32> to vector<1x8x8xf32>
      tpu.vector_store %arg15[%c2_122, %c0_123, %c0_124], %130 {strides = array<i32>} : memref<4x8x8xf32, #tpu.memory_space<vmem>>, vector<1x8x8xf32>,
      %c3_125 = arith.constant 3 : index
      %c0_126 = arith.constant 0 : index
      %c0_127 = arith.constant 0 : index
      %131 = vector.load %arg6[%c3_125, %c0_126, %c0_127] : memref<4x32x8xf32, #tpu.memory_space<vmem>>, vector<1x32x8xf32>
      %132 = vector.shape_cast %131 : vector<1x32x8xf32> to vector<32x8xf32>
      %cst_128 = arith.constant dense<0.000000e+00> : vector<8x8xf32>
      %133 = tpu.matmul %70, %132, %cst_128 {dimension_numbers = #tpu.dot_dimension_numbers<[1], [0], [0], [1], [0, 0, 1, 1], [], []>} : vector<8x32xf32>, vector<32x8xf32>, vector<8x8xf32> -> vector<8x8xf32>
      %c3_129 = arith.constant 3 : index
      %c0_130 = arith.constant 0 : index
      %c0_131 = arith.constant 0 : index
      %134 = vector.load %arg7[%c3_129, %c0_130, %c0_131] : memref<4x1x8xf32, #tpu.memory_space<vmem>>, vector<1x1x8xf32>
      %135 = vector.shape_cast %134 : vector<1x1x8xf32> to vector<1x8xf32>
      %136 = vector.broadcast %135 : vector<1x8xf32> to vector<8x8xf32>
      %137 = arith.addf %133, %136 : vector<8x8xf32>
      %c3_132 = arith.constant 3 : index
      %c0_133 = arith.constant 0 : index
      %c0_134 = arith.constant 0 : index
      %138 = vector.load %arg14[%c3_132, %c0_133, %c0_134] : memref<4x8x8xf32, #tpu.memory_space<vmem>>, vector<1x8x8xf32>
      %139 = vector.shape_cast %138 : vector<1x8x8xf32> to vector<8x8xf32>
      %140 = vector.shape_cast %137 : vector<8x8xf32> to vector<1x8x8xf32>
      tpu.vector_store %arg14[%c3_132, %c0_133, %c0_134], %140 {strides = array<i32>} : memref<4x8x8xf32, #tpu.memory_space<vmem>>, vector<1x8x8xf32>,
      %c3_135 = arith.constant 3 : index
      %c0_136 = arith.constant 0 : index
      %c0_137 = arith.constant 0 : index
      %141 = vector.load %arg8[%c3_135, %c0_136, %c0_137] : memref<4x32x8xf32, #tpu.memory_space<vmem>>, vector<1x32x8xf32>
      %142 = vector.shape_cast %141 : vector<1x32x8xf32> to vector<32x8xf32>
      %cst_138 = arith.constant dense<0.000000e+00> : vector<8x8xf32>
      %143 = tpu.matmul %70, %142, %cst_138 {dimension_numbers = #tpu.dot_dimension_numbers<[1], [0], [0], [1], [0, 0, 1, 1], [], []>} : vector<8x32xf32>, vector<32x8xf32>, vector<8x8xf32> -> vector<8x8xf32>
      %c3_139 = arith.constant 3 : index
      %c0_140 = arith.constant 0 : index
      %c0_141 = arith.constant 0 : index
      %144 = vector.load %arg9[%c3_139, %c0_140, %c0_141] : memref<4x1x8xf32, #tpu.memory_space<vmem>>, vector<1x1x8xf32>
      %145 = vector.shape_cast %144 : vector<1x1x8xf32> to vector<1x8xf32>
      %146 = vector.broadcast %145 : vector<1x8xf32> to vector<8x8xf32>
      %147 = arith.addf %143, %146 : vector<8x8xf32>
      %c3_142 = arith.constant 3 : index
      %c0_143 = arith.constant 0 : index
      %c0_144 = arith.constant 0 : index
      %148 = vector.load %arg15[%c3_142, %c0_143, %c0_144] : memref<4x8x8xf32, #tpu.memory_space<vmem>>, vector<1x8x8xf32>
      %149 = vector.shape_cast %148 : vector<1x8x8xf32> to vector<8x8xf32>
      %150 = vector.shape_cast %147 : vector<8x8xf32> to vector<1x8x8xf32>
      tpu.vector_store %arg15[%c3_142, %c0_143, %c0_144], %150 {strides = array<i32>} : memref<4x8x8xf32, #tpu.memory_space<vmem>>, vector<1x8x8xf32>,
    } else {
    }
    %c0 = arith.constant 0 : index
    %c0_1 = arith.constant 0 : index
    %c0_2 = arith.constant 0 : index
    %3 = vector.load %arg3[%c0, %c0_1, %c0_2] : memref<1x8x32xf32, #tpu.memory_space<vmem>>, vector<1x8x32xf32>
    %4 = vector.shape_cast %3 : vector<1x8x32xf32> to vector<8x32xf32>
    %c0_3 = arith.constant 0 : index
    %c0_4 = arith.constant 0 : index
    %c0_5 = arith.constant 0 : index
    %5 = vector.load %arg4[%c0_3, %c0_4, %c0_5] : memref<4x32x8xf32, #tpu.memory_space<vmem>>, vector<1x32x8xf32>
    %6 = vector.shape_cast %5 : vector<1x32x8xf32> to vector<32x8xf32>
    %cst = arith.constant dense<0.000000e+00> : vector<8x8xf32>
    %7 = tpu.matmul %4, %6, %cst {dimension_numbers = #tpu.dot_dimension_numbers<[1], [0], [0], [1], [0, 0, 1, 1], [], []>} : vector<8x32xf32>, vector<32x8xf32>, vector<8x8xf32> -> vector<8x8xf32>
    %c0_6 = arith.constant 0 : index
    %c0_7 = arith.constant 0 : index
    %c0_8 = arith.constant 0 : index
    %8 = vector.load %arg5[%c0_6, %c0_7, %c0_8] : memref<4x1x8xf32, #tpu.memory_space<vmem>>, vector<1x1x8xf32>
    %9 = vector.shape_cast %8 : vector<1x1x8xf32> to vector<1x8xf32>
    %10 = vector.broadcast %9 : vector<1x8xf32> to vector<8x8xf32>
    %11 = arith.addf %7, %10 : vector<8x8xf32>
    %c0_9 = arith.constant 0 : index
    %c0_10 = arith.constant 0 : index
    %c0_11 = arith.constant 0 : index
    %12 = vector.load %arg13[%c0_9, %c0_10, %c0_11] : memref<4x8x8xf32, #tpu.memory_space<vmem>>, vector<1x8x8xf32>
    %13 = vector.shape_cast %12 : vector<1x8x8xf32> to vector<8x8xf32>
    %14 = vector.shape_cast %11 : vector<8x8xf32> to vector<1x8x8xf32>
    tpu.vector_store %arg13[%c0_9, %c0_10, %c0_11], %14 {strides = array<i32>} : memref<4x8x8xf32, #tpu.memory_space<vmem>>, vector<1x8x8xf32>,
    %c1 = arith.constant 1 : index
    %c0_12 = arith.constant 0 : index
    %c0_13 = arith.constant 0 : index
    %15 = vector.load %arg4[%c1, %c0_12, %c0_13] : memref<4x32x8xf32, #tpu.memory_space<vmem>>, vector<1x32x8xf32>
    %16 = vector.shape_cast %15 : vector<1x32x8xf32> to vector<32x8xf32>
    %cst_14 = arith.constant dense<0.000000e+00> : vector<8x8xf32>
    %17 = tpu.matmul %4, %16, %cst_14 {dimension_numbers = #tpu.dot_dimension_numbers<[1], [0], [0], [1], [0, 0, 1, 1], [], []>} : vector<8x32xf32>, vector<32x8xf32>, vector<8x8xf32> -> vector<8x8xf32>
    %c1_15 = arith.constant 1 : index
    %c0_16 = arith.constant 0 : index
    %c0_17 = arith.constant 0 : index
    %18 = vector.load %arg5[%c1_15, %c0_16, %c0_17] : memref<4x1x8xf32, #tpu.memory_space<vmem>>, vector<1x1x8xf32>
    %19 = vector.shape_cast %18 : vector<1x1x8xf32> to vector<1x8xf32>
    %20 = vector.broadcast %19 : vector<1x8xf32> to vector<8x8xf32>
    %21 = arith.addf %17, %20 : vector<8x8xf32>
    %c1_18 = arith.constant 1 : index
    %c0_19 = arith.constant 0 : index
    %c0_20 = arith.constant 0 : index
    %22 = vector.load %arg13[%c1_18, %c0_19, %c0_20] : memref<4x8x8xf32, #tpu.memory_space<vmem>>, vector<1x8x8xf32>
    %23 = vector.shape_cast %22 : vector<1x8x8xf32> to vector<8x8xf32>
    %24 = vector.shape_cast %21 : vector<8x8xf32> to vector<1x8x8xf32>
    tpu.vector_store %arg13[%c1_18, %c0_19, %c0_20], %24 {strides = array<i32>} : memref<4x8x8xf32, #tpu.memory_space<vmem>>, vector<1x8x8xf32>,
    %c2 = arith.constant 2 : index
    %c0_21 = arith.constant 0 : index
    %c0_22 = arith.constant 0 : index
    %25 = vector.load %arg4[%c2, %c0_21, %c0_22] : memref<4x32x8xf32, #tpu.memory_space<vmem>>, vector<1x32x8xf32>
    %26 = vector.shape_cast %25 : vector<1x32x8xf32> to vector<32x8xf32>
    %cst_23 = arith.constant dense<0.000000e+00> : vector<8x8xf32>
    %27 = tpu.matmul %4, %26, %cst_23 {dimension_numbers = #tpu.dot_dimension_numbers<[1], [0], [0], [1], [0, 0, 1, 1], [], []>} : vector<8x32xf32>, vector<32x8xf32>, vector<8x8xf32> -> vector<8x8xf32>
    %c2_24 = arith.constant 2 : index
    %c0_25 = arith.constant 0 : index
    %c0_26 = arith.constant 0 : index
    %28 = vector.load %arg5[%c2_24, %c0_25, %c0_26] : memref<4x1x8xf32, #tpu.memory_space<vmem>>, vector<1x1x8xf32>
    %29 = vector.shape_cast %28 : vector<1x1x8xf32> to vector<1x8xf32>
    %30 = vector.broadcast %29 : vector<1x8xf32> to vector<8x8xf32>
    %31 = arith.addf %27, %30 : vector<8x8xf32>
    %c2_27 = arith.constant 2 : index
    %c0_28 = arith.constant 0 : index
    %c0_29 = arith.constant 0 : index
    %32 = vector.load %arg13[%c2_27, %c0_28, %c0_29] : memref<4x8x8xf32, #tpu.memory_space<vmem>>, vector<1x8x8xf32>
    %33 = vector.shape_cast %32 : vector<1x8x8xf32> to vector<8x8xf32>
    %34 = vector.shape_cast %31 : vector<8x8xf32> to vector<1x8x8xf32>
    tpu.vector_store %arg13[%c2_27, %c0_28, %c0_29], %34 {strides = array<i32>} : memref<4x8x8xf32, #tpu.memory_space<vmem>>, vector<1x8x8xf32>,
    %c3 = arith.constant 3 : index
    %c0_30 = arith.constant 0 : index
    %c0_31 = arith.constant 0 : index
    %35 = vector.load %arg4[%c3, %c0_30, %c0_31] : memref<4x32x8xf32, #tpu.memory_space<vmem>>, vector<1x32x8xf32>
    %36 = vector.shape_cast %35 : vector<1x32x8xf32> to vector<32x8xf32>
    %cst_32 = arith.constant dense<0.000000e+00> : vector<8x8xf32>
    %37 = tpu.matmul %4, %36, %cst_32 {dimension_numbers = #tpu.dot_dimension_numbers<[1], [0], [0], [1], [0, 0, 1, 1], [], []>} : vector<8x32xf32>, vector<32x8xf32>, vector<8x8xf32> -> vector<8x8xf32>
    %c3_33 = arith.constant 3 : index
    %c0_34 = arith.constant 0 : index
    %c0_35 = arith.constant 0 : index
    %38 = vector.load %arg5[%c3_33, %c0_34, %c0_35] : memref<4x1x8xf32, #tpu.memory_space<vmem>>, vector<1x1x8xf32>
    %39 = vector.shape_cast %38 : vector<1x1x8xf32> to vector<1x8xf32>
    %40 = vector.broadcast %39 : vector<1x8xf32> to vector<8x8xf32>
    %41 = arith.addf %37, %40 : vector<8x8xf32>
    %c3_36 = arith.constant 3 : index
    %c0_37 = arith.constant 0 : index
    %c0_38 = arith.constant 0 : index
    %42 = vector.load %arg13[%c3_36, %c0_37, %c0_38] : memref<4x8x8xf32, #tpu.memory_space<vmem>>, vector<1x8x8xf32>
    %43 = vector.shape_cast %42 : vector<1x8x8xf32> to vector<8x8xf32>
    %44 = vector.shape_cast %41 : vector<8x8xf32> to vector<1x8x8xf32>
    tpu.vector_store %arg13[%c3_36, %c0_37, %c0_38], %44 {strides = array<i32>} : memref<4x8x8xf32, #tpu.memory_space<vmem>>, vector<1x8x8xf32>,
    %c0_39 = arith.constant 0 : index
    %c0_40 = arith.constant 0 : index
    %c0_41 = arith.constant 0 : index
    %45 = vector.load %arg13[%c0_39, %c0_40, %c0_41] : memref<4x8x8xf32, #tpu.memory_space<vmem>>, vector<4x8x8xf32>
    %c0_42 = arith.constant 0 : index
    %c0_43 = arith.constant 0 : index
    %c0_44 = arith.constant 0 : index
    %46 = vector.load %arg14[%c0_42, %c0_43, %c0_44] : memref<4x8x8xf32, #tpu.memory_space<vmem>>, vector<4x8x8xf32>
    %c0_45 = arith.constant 0 : index
    %c0_46 = arith.constant 0 : index
    %c0_47 = arith.constant 0 : index
    %47 = vector.load %arg15[%c0_45, %c0_46, %c0_47] : memref<4x8x8xf32, #tpu.memory_space<vmem>>, vector<4x8x8xf32>
    "tpu.trace_start"() <{level = 10 : i32, message = "htd,hnd->htn"}> : () -> ()
    %cst_48 = arith.constant dense<0.000000e+00> : vector<4x8x8xf32>
    %48 = tpu.matmul %45, %46, %cst_48 {dimension_numbers = #tpu.dot_dimension_numbers<[2], [2], [1], [1], [0, 0, 0, 1, 1, 1], [0], [0]>} : vector<4x8x8xf32>, vector<4x8x8xf32>, vector<4x8x8xf32> -> vector<4x8x8xf32>
    "tpu.trace_stop"() : () -> ()
    %cst_49 = arith.constant dense<0xFF800000> : vector<4x8xf32>
    %49 = vector.multi_reduction <maximumf>, %48, %cst_49 [2] : vector<4x8x8xf32> to vector<4x8xf32>
    %50 = vector.shape_cast %49 : vector<4x8xf32> to vector<4x8x1xf32>
    %51 = vector.broadcast %50 : vector<4x8x1xf32> to vector<4x8x8xf32>
    %52 = arith.subf %48, %51 : vector<4x8x8xf32>
    %53 = math.exp %52 : vector<4x8x8xf32>
    %cst_50 = arith.constant dense<0.000000e+00> : vector<4x8xf32>
    %54 = vector.multi_reduction <add>, %53, %cst_50 [2] : vector<4x8x8xf32> to vector<4x8xf32>
    %55 = vector.shape_cast %54 : vector<4x8xf32> to vector<4x8x1xf32>
    %56 = tpu.reciprocal %55 : vector<4x8x1xf32> -> vector<4x8x1xf32>
    %57 = vector.broadcast %56 : vector<4x8x1xf32> to vector<4x8x8xf32>
    %58 = arith.mulf %53, %57 : vector<4x8x8xf32>
    "tpu.trace_start"() <{level = 10 : i32, message = "htn,hnd->htd"}> : () -> ()
    %cst_51 = arith.constant dense<0.000000e+00> : vector<4x8x8xf32>
    %59 = tpu.matmul %58, %47, %cst_51 {dimension_numbers = #tpu.dot_dimension_numbers<[2], [1], [1], [2], [0, 0, 0, 1, 1, 2], [0], [0]>} : vector<4x8x8xf32>, vector<4x8x8xf32>, vector<4x8x8xf32> -> vector<4x8x8xf32>
    "tpu.trace_stop"() : () -> ()
    %c0_52 = arith.constant 0 : index
    %c0_53 = arith.constant 0 : index
    %c0_54 = arith.constant 0 : index
    %60 = vector.load %arg10[%c0_52, %c0_53, %c0_54] : memref<4x8x32xf32, #tpu.memory_space<vmem>>, vector<4x8x32xf32>
    "tpu.trace_start"() <{level = 10 : i32, message = "htd,hdc->htc"}> : () -> ()
    %cst_55 = arith.constant dense<0.000000e+00> : vector<4x8x32xf32>
    %61 = tpu.matmul %59, %60, %cst_55 {dimension_numbers = #tpu.dot_dimension_numbers<[2], [1], [1], [2], [0, 0, 0, 1, 1, 2], [0], [0]>} : vector<4x8x8xf32>, vector<4x8x32xf32>, vector<4x8x32xf32> -> vector<4x8x32xf32>
    "tpu.trace_stop"() : () -> ()
    %cst_56 = arith.constant dense<0.000000e+00> : vector<8x32xf32>
    %62 = vector.multi_reduction <add>, %61, %cst_56 [0] : vector<4x8x32xf32> to vector<8x32xf32>
    %c0_57 = arith.constant 0 : index
    %c0_58 = arith.constant 0 : index
    %63 = vector.load %arg11[%c0_57, %c0_58] : memref<1x32xf32, #tpu.memory_space<vmem>>, vector<1x32xf32>
    %64 = vector.broadcast %63 : vector<1x32xf32> to vector<8x32xf32>
    %65 = arith.addf %62, %64 : vector<8x32xf32>
    %c0_59 = arith.constant 0 : index
    %c0_60 = arith.constant 0 : index
    %c0_61 = arith.constant 0 : index
    %66 = vector.load %arg12[%c0_59, %c0_60, %c0_61] : memref<1x8x32xf32, #tpu.memory_space<vmem>>, vector<1x8x32xf32>
    %67 = vector.shape_cast %66 : vector<1x8x32xf32> to vector<8x32xf32>
    %68 = vector.shape_cast %65 : vector<8x32xf32> to vector<1x8x32xf32>
    tpu.vector_store %arg12[%c0_59, %c0_60, %c0_61], %68 {strides = array<i32>} : memref<1x8x32xf32, #tpu.memory_space<vmem>>, vector<1x8x32xf32>,
    return
  }
  func.func @transform_0(%arg0: i32, %arg1: i32) -> (i32, i32, i32) {
    %c0_i32 = arith.constant 0 : i32
    %c0_i32_0 = arith.constant 0 : i32
    %c0_i32_1 = arith.constant 0 : i32
    return %arg0, %c0_i32, %c0_i32_0 : i32, i32, i32
  }
  func.func @transform_1(%arg0: i32, %arg1: i32) -> (i32, i32, i32) {
    %c0_i32 = arith.constant 0 : i32
    %c0_i32_0 = arith.constant 0 : i32
    return %arg0, %arg1, %c0_i32 : i32, i32, i32
  }
  func.func @transform_2(%arg0: i32, %arg1: i32) -> (i32, i32, i32) {
    %c0_i32 = arith.constant 0 : i32
    %c0_i32_0 = arith.constant 0 : i32
    %c0_i32_1 = arith.constant 0 : i32
    %c0_i32_2 = arith.constant 0 : i32
    return %c0_i32, %c0_i32_0, %c0_i32_1 : i32, i32, i32
  }
  func.func @transform_3(%arg0: i32, %arg1: i32) -> (i32, i32, i32) {
    %c0_i32 = arith.constant 0 : i32
    %c0_i32_0 = arith.constant 0 : i32
    %c0_i32_1 = arith.constant 0 : i32
    %c0_i32_2 = arith.constant 0 : i32
    return %c0_i32, %c0_i32_0, %c0_i32_1 : i32, i32, i32
  }
  func.func @transform_4(%arg0: i32, %arg1: i32) -> (i32, i32, i32) {
    %c0_i32 = arith.constant 0 : i32
    %c0_i32_0 = arith.constant 0 : i32
    %c0_i32_1 = arith.constant 0 : i32
    %c0_i32_2 = arith.constant 0 : i32
    return %c0_i32, %c0_i32_0, %c0_i32_1 : i32, i32, i32
  }
  func.func @transform_5(%arg0: i32, %arg1: i32) -> (i32, i32, i32) {
    %c0_i32 = arith.constant 0 : i32
    %c0_i32_0 = arith.constant 0 : i32
    %c0_i32_1 = arith.constant 0 : i32
    %c0_i32_2 = arith.constant 0 : i32
    return %c0_i32, %c0_i32_0, %c0_i32_1 : i32, i32, i32
  }
  func.func @transform_6(%arg0: i32, %arg1: i32) -> (i32, i32, i32) {
    %c0_i32 = arith.constant 0 : i32
    %c0_i32_0 = arith.constant 0 : i32
    %c0_i32_1 = arith.constant 0 : i32
    %c0_i32_2 = arith.constant 0 : i32
    return %c0_i32, %c0_i32_0, %c0_i32_1 : i32, i32, i32
  }
  func.func @transform_7(%arg0: i32, %arg1: i32) -> (i32, i32, i32) {
    %c0_i32 = arith.constant 0 : i32
    %c0_i32_0 = arith.constant 0 : i32
    %c0_i32_1 = arith.constant 0 : i32
    %c0_i32_2 = arith.constant 0 : i32
    return %c0_i32, %c0_i32_0, %c0_i32_1 : i32, i32, i32
  }
  func.func @transform_8(%arg0: i32, %arg1: i32) -> (i32, i32, i32) {
    %c0_i32 = arith.constant 0 : i32
    %c0_i32_0 = arith.constant 0 : i32
    %c0_i32_1 = arith.constant 0 : i32
    %c0_i32_2 = arith.constant 0 : i32
    return %c0_i32, %c0_i32_0, %c0_i32_1 : i32, i32, i32
  }
  func.func @transform_9(%arg0: i32, %arg1: i32) -> (i32, i32) {
    %c0_i32 = arith.constant 0 : i32
    %c0_i32_0 = arith.constant 0 : i32
    %c0_i32_1 = arith.constant 0 : i32
    return %c0_i32, %c0_i32_0 : i32, i32
  }
  func.func @transform_10(%arg0: i32, %arg1: i32) -> (i32, i32, i32) {
    %c0_i32 = arith.constant 0 : i32
    %c0_i32_0 = arith.constant 0 : i32
    return %arg0, %arg1, %c0_i32 : i32, i32, i32
  }
}

</mosaic_0001>

<bundles_post_ra>
// kernel: tpu_custom_call.1
= control target key start
LH: loop header
LB: loop body
LE: loop exit
PB: predicated region body
PF: predicated region fallthrough
CT: control target
= control target key end

     0   :  { %15 = vsyncpa [#allocation6], 0  ;;  %s3609_s0 = inlined_call_operand.vmem [shape: f32[2,8,32], index: 0, kind: input, shape index: {}]   ;;  %s3610_s1 = inlined_call_operand.vmem [shape: f32[2,8,32], index: 1, kind: input, shape index: {}]   ;;  %s3611_s2 = inlined_call_operand.vmem [shape: f32[4,32,8], index: 2, kind: input, shape index: {}]   ;;  %s3612_s3 = inlined_call_operand.vmem [shape: f32[4,1,8], index: 3, kind: input, shape index: {}]   ;;  %s3613_s4 = inlined_call_operand.vmem [shape: f32[4,32,8], index: 4, kind: input, shape index: {}]   ;;  %s3614_s5 = inlined_call_operand.vmem [shape: f32[4,1,8], index: 5, kind: input, shape index: {}]   ;;  %s3615_s6 = inlined_call_operand.vmem [shape: f32[4,32,8], index: 6, kind: input, shape index: {}]   ;;  %s3616_s7 = inlined_call_operand.vmem [shape: f32[4,1,8], index: 7, kind: input, shape index: {}]   ;;  %s3617_s8 = inlined_call_operand.vmem [shape: f32[4,8,32], index: 8, kind: input, shape index: {}]   ;;  %s3618_s9 = inlined_call_operand.vmem [shape: f32[1,32], index: 9, kind: input, shape index: {}]   ;;  %s3619_s10 = inlined_call_operand.hbm [shape: f32[2,8,32], index: 10, kind: output, shape index: {}]  }
   0x1   :  { %17 = vsyncpa [#allocation6 + $0x1], 0  ;;  %s3145_s13 = smov 0   ;;  %s3147_s14 = smov 0  }
   0x2   :  { %s3149_s15 = smov 0   ;;  %s3151_s16 = smov 0  }
   0x3   :  { %s3153_s17 = smov 0   ;;  %s3155_s18 = smov 0  }
   0x4 LB: > { %3622 = sst [smem:[#allocation8_spill]] %s3080_s17  ;;  %s2486_s19 = sadd.s32 4294967295, %s3084_s18   ;;  %s3084_s18 = sphi %s3155_s18, %s23_s18   ;;  %s3080_s17 = sphi %s3153_s17, %s3627_s17   ;;  %s3076_s16 = sphi %s3151_s16, %s3626_s16   ;;  %s3072_s15 = sphi %s3149_s15, %s3630_s15   ;;  %s3068_s14 = sphi %s3147_s14, %s3629_s14   ;;  %s3064_s13 = sphi %s3145_s13, %s3628_s13  }
   0x5   : > { %s2487_s20 = sadd.s32 4294967294, %s3084_s18   ;;  %s35_s21 = sadd.s32 1, %s3080_s17 }
   0x6   : > { %s266_s22 = sadd.s32 1, %s3072_s15  ;;  %p37_p0 = scmp.ge.s32.totalorder %s35_s21, 2 }
   0x7   : > { %p276_p1 = scmp.ne.s32.totalorder %s3072_s15, %s3068_s14  ;;  %p277_p2 = scmp.eq.s32.totalorder %s2486_s19, 1 }
   0x8   : > { %p282_p3 = scmp.ne.s32.totalorder %s3068_s14, %s3064_s13  ;;  %s3632_s21 = smov (%p37_p0, %s35_s21), 0 }
   0x9   : > { %3623 = sst [smem:[#allocation9_spill]] %s3632_s21  ;;  %p3185_p4 = por %p277_p2, %p276_p1 }
   0xa   : > { %p283_p5 = scmp.eq.s32.totalorder %s2487_s20, 1  ;;  %s261_s24 = ssub.s32 %s3080_s17, %s3632_s21 }
   0xb   : > { %p2490_p6 = scmp.ge.s32.totalorder %s3084_s18, 1  ;;  %p264_p7 = scmp.eq.s32.totalorder %s261_s24, 0 }
   0xc   : > { %p3192_p8 = por %p283_p5, %p282_p3  ;;  %p342_p9 = scmp.lt.s32.totalorder %s3084_s18, 3 }
   0xd   : > { %s3198_s26 = scalar_select %p264_p7, %s3072_s15, %s266_s22  }
   0xe   : > { %p343_p10 = pnand %p2490_p6, %p342_p9 }
   0xf   : > { %v402_v0 = vld [vmem:[%s3613_s4] sm:$0xff] (!%p343_p10)  ;;  %v403_v1 = vld [vmem:[%s3613_s4 + $0x8] sm:$0xff] (!%p343_p10)  ;;  %v3086_v3 = vmov (!%p343_p10), 0.0|0.0   ;;  %v404_v6 = vld [vmem:[%s3613_s4 + $0x10] sm:$0xff] (!%p343_p10)  ;;  %p386_p11 = scmp.lt.s32.totalorder (!%p343_p10), %s3076_s16, 1  ;;  %vm3087_vm0 = vmmov (!%p343_p10), 0  }
  0x10   : > { %346 = sbr.rel (%p343_p10) target bundleno = 1263 (0x4ef), region = 60  ;;  %v489_v2 = vld [vmem:[%s3615_s6] sm:$0xff] (!%p343_p10)  ;;  %2860 = vmatprep.subr.bf16.mxu0 (!%p343_p10), %v3086_v3  ;;  %2866 = vmatprep.subr.bf16.mxu1 (!%p343_p10), %v3086_v3  ;;  %v2861_v4 = vpack.c.bf16 (!%p343_p10), %v403_v1, %v402_v0  ;;  %v490_v5 = vld [vmem:[%s3615_s6 + $0x8] sm:$0xff] (!%p343_p10)  ;;  %v405_v7 = vld [vmem:[%s3613_s4 + $0x18] sm:$0xff] (!%p343_p10)  ;;  %v3088_v11 = vmov (!%p343_p10), 0.0   ;;  %vm413_vm1 = vcmask (!%p343_p10), 261120  }
  0x11   : > { %v2867_v8 = vpack.c.bf16 (!%p343_p10), %v490_v5, %v489_v2  ;;  %v491_v9 = vld [vmem:[%s3615_s6 + $0x10] sm:$0xff] (!%p343_p10)  ;;  %v492_v10 = vld [vmem:[%s3615_s6 + $0x18] sm:$0xff] (!%p343_p10)  ;;  %2676 = vmatprep.mubr.msk.f32.mxu0 (!%p343_p10), %vm3087_vm0, %v3088_v11  ;;  %2687 = vmatprep.mubr.msk.f32.mxu1 (!%p343_p10), %vm3087_vm0, %v3088_v11  ;;  %v2864_v12 = vpack.c.bf16 (!%p343_p10), %v405_v7, %v404_v6  ;;  %v2498_v14 = vld [vmem:[%s3613_s4 + $0x20] sm:$0xff] (!%p343_p10)  ;;  %vm487_vm2 = vcmask (!%p343_p10), 64512   ;;  %s383_s22 = sand.u32 (!%p343_p10), 1, %s3068_s14   ;;  %s2581_s29 = sshll.u32 (!%p343_p10), %s3076_s16, 7 }
  0x12   : > { %2862 = vmatpush3.bf16.msra.mxu0 (!%p343_p10), %v2861_v4  ;;  %v2870_v13 = vpack.c.bf16 (!%p343_p10), %v492_v10, %v491_v9  ;;  %v2499_v15 = vld [vmem:[%s3613_s4 + $0x28] sm:$0xff] (!%p343_p10)  ;;  %v2505_v16 = vld [vmem:[%s3615_s6 + $0x20] sm:$0xff] (!%p343_p10)  ;;  %v2500_v21 = vld [vmem:[%s3613_s4 + $0x30] sm:$0xff] (!%p343_p10)  ;;  %s2491_s24 = sshll.u32 (!%p343_p10), %s383_s22, 3  ;;  %s3561_s30 = scalar_lea.hbm (!%p343_p10), %s3619_s10, %s2581_s29 }
  0x13   : > { %2868 = vmatpush3.bf16.msra.mxu1 (!%p343_p10), %v2867_v8  ;;  %2863 = vmatprep.subr.bf16.mxu0 (!%p343_p10), %v3086_v3  ;;  %v2506_v17 = vld [vmem:[%s3615_s6 + $0x28] sm:$0xff] (!%p343_p10)  ;;  %v2873_v19 = vpack.c.bf16 (!%p343_p10), %v2499_v15, %v2498_v14  ;;  %v2501_v22 = vld [vmem:[%s3613_s4 + $0x38] sm:$0xff] (!%p343_p10)  ;;  %v2507_v23 = vld [vmem:[%s3615_s6 + $0x30] sm:$0xff] (!%p343_p10)  ;;  %s385_s17 = scalar_lea.vmem (!%p343_p10), [#allocation5], %s2491_s24  ;;  %s2389_s11 = scalar_lea.sflag (!%p343_p10), [#allocation6], %s383_s22 }
  0x14   : > { %2869 = vmatprep.subr.bf16.mxu1 (!%p343_p10), %v3086_v3  ;;  %v2879_v20 = vpack.c.bf16 (!%p343_p10), %v2506_v17, %v2505_v16  ;;  %v2508_v24 = vld [vmem:[%s3615_s6 + $0x38] sm:$0xff] (!%p343_p10)  ;;  %v2876_v25 = vpack.c.bf16 (!%p343_p10), %v2501_v22, %v2500_v21  ;;  %v2512_v27 = vld [vmem:[%s3613_s4 + $0x40] sm:$0xff] (!%p343_p10)  ;;  %v2513_v28 = vld [vmem:[%s3613_s4 + $0x48] sm:$0xff] (!%p343_p10) }
  0x15   : > { %v2882_v26 = vpack.c.bf16 (!%p343_p10), %v2508_v24, %v2507_v23  ;;  %v2519_v29 = vld [vmem:[%s3615_s6 + $0x40] sm:$0xff] (!%p343_p10)  ;;  %v2520_v30 = vld [vmem:[%s3615_s6 + $0x48] sm:$0xff] (!%p343_p10)  ;;  %v2885_v31 = vpack.c.bf16 (!%p343_p10), %v2513_v28, %v2512_v27  ;;  %v2514_v33 = vld [vmem:[%s3613_s4 + $0x50] sm:$0xff] (!%p343_p10) }
  0x16   : > { %2865 = vmatpush3.bf16.msra.mxu0 (!%p343_p10), %v2864_v12  ;;  %v2891_v32 = vpack.c.bf16 (!%p343_p10), %v2520_v30, %v2519_v29  ;;  %v2515_v34 = vld [vmem:[%s3613_s4 + $0x58] sm:$0xff] (!%p343_p10)  ;;  %v2521_v35 = vld [vmem:[%s3615_s6 + $0x50] sm:$0xff] (!%p343_p10)  ;;  %v2526_v39 = vld [vmem:[%s3613_s4 + $0x60] sm:$0xff] (!%p343_p10) }
  0x17   : > { %s3232_s19 = scalar_select %p386_p11, %s3076_s16, 1  ;;  %2871 = vmatpush3.bf16.msra.mxu1 %v2870_v13  ;;  %2872 = vmatprep.subr.bf16.mxu0 %v3086_v3  ;;  %v2522_v36 = vld [vmem:[%s3615_s6 + $0x58] sm:$0xff]  ;;  %v2888_v37 = vpack.c.bf16 %v2515_v34, %v2514_v33  ;;  %v2527_v40 = vld [vmem:[%s3613_s4 + $0x68] sm:$0xff]  ;;  %v2533_v41 = vld [vmem:[%s3615_s6 + $0x60] sm:$0xff] }
  0x18   : > { %2878 = vmatprep.subr.bf16.mxu1 %v3086_v3  ;;  %v2894_v38 = vpack.c.bf16 %v2522_v36, %v2521_v35  ;;  %v2534_v42 = vld [vmem:[%s3615_s6 + $0x68] sm:$0xff]  ;;  %v2897_v43 = vpack.c.bf16 %v2527_v40, %v2526_v39  ;;  %v2528_v45 = vld [vmem:[%s3613_s4 + $0x70] sm:$0xff]  ;;  %v2529_v46 = vld [vmem:[%s3613_s4 + $0x78] sm:$0xff]  ;;  %s3089_s16 = smov [#allocation5]  }
  0x19   : > { %s2492_s28 = sshll.u32 %s3232_s19, 3  ;;  %v2903_v44 = vpack.c.bf16 %v2534_v42, %v2533_v41  ;;  %v2535_v47 = vld [vmem:[%s3615_s6 + $0x70] sm:$0xff]  ;;  %v2536_v48 = vld [vmem:[%s3615_s6 + $0x78] sm:$0xff]  ;;  %v2900_v49 = vpack.c.bf16 %v2529_v46, %v2528_v45  ;;  %v1082_v51 = vld [vmem:[%s3611_s2] sm:$0xff]  ;;  %s2403_s19 = sshll.u32 %s385_s17, 4  ;;  %s3563_s19 = int_to_ptr.vmem [resolvable:$true] %s2403_s19 }
  0x1a   : > { %s389_s20 = scalar_lea.vmem %s3609_s0, %s2492_s28  ;;  %v2906_v50 = vpack.c.bf16 %v2536_v48, %v2535_v47  ;;  %v1083_v52 = vld [vmem:[%s3611_s2 + $0x8] sm:$0xff]  ;;  %v2542_v53 = vld [vmem:[%s3611_s2 + $0x20] sm:$0xff]  ;;  %v1084_v57 = vld [vmem:[%s3611_s2 + $0x10] sm:$0xff]  ;;  %s396_s12 = scalar_lea.vmem %s3610_s1, %s2492_s28 }
  0x1b   : > { %v3254_v18 = vld [vmem:[%s389_s20] sm:$0xff]  ;;  %v2543_v54 = vld [vmem:[%s3611_s2 + $0x28] sm:$0xff]  ;;  %v2909_v55 = vpack.c.bf16 %v1083_v52, %v1082_v51  ;;  %v1085_v58 = vld [vmem:[%s3611_s2 + $0x18] sm:$0xff]  ;;  %s3006_s20 = scalar_lea.vmem %s3563_s19, 128  ;;  %s3010_s24 = sshll.u32 %s3089_s16, 4  ;;  %s3011_s24 = int_to_ptr.vmem [resolvable:$false] %s3010_s24 }
  0x1c   : > { %2677 = vmatmul.mubr.msk.f32.vlgmr.msra.gmra.mrb[0].mxu0 %vm413_vm1, %v3254_v18  ;;  %2688 = vmatmul.mubr.msk.f32.vlgmr.msra.gmra.mrb[0].mxu1 %vm413_vm1, %v3254_v18  ;;  %v2915_v56 = vpack.c.bf16 %v2543_v54, %v2542_v53  ;;  %v2544_v59 = vld [vmem:[%s3611_s2 + $0x30] sm:$0xff]  ;;  %v2545_v60 = vld [vmem:[%s3611_s2 + $0x38] sm:$0xff]  ;;  %v2912_v61 = vpack.c.bf16 %v1085_v58, %v1084_v57  ;;  %v2549_v63 = vld [vmem:[%s3611_s2 + $0x40] sm:$0xff]  ;;  %p3007_p12 = scmp.ne.s32.totalorder %s3563_s19, %s3006_s20  ;;  %p3013_p1 = scmp.lt.s32.totalorder %s3563_s19, %s3011_s24 }
  0x1d   : > { %2874 = vmatpush3.bf16.msra.mxu0 %v2873_v19  ;;  %2880 = vmatpush3.bf16.msra.mxu1 %v2879_v20  ;;  %v2918_v62 = vpack.c.bf16 %v2545_v60, %v2544_v59  ;;  %v2550_v0 = vld [vmem:[%s3611_s2 + $0x48] sm:$0xff]  ;;  %v2556_v1 = vld [vmem:[%s3611_s2 + $0x60] sm:$0xff]  ;;  %v2551_v7 = vld [vmem:[%s3611_s2 + $0x50] sm:$0xff] }
  0x1e   : > { %2875 = vmatprep.subr.bf16.mxu0 %v3086_v3  ;;  %2881 = vmatprep.subr.bf16.mxu1 %v3086_v3  ;;  %v2557_v2 = vld [vmem:[%s3611_s2 + $0x68] sm:$0xff]  ;;  %v1081_v4 = vld [vmem:[%s396_s12] sm:$0xff]  ;;  %v2921_v5 = vpack.c.bf16 %v2550_v0, %v2549_v63  ;;  %v2552_v8 = vld [vmem:[%s3611_s2 + $0x58] sm:$0xff]  ;;  %p3008_p13 = pnand %p3007_p12, %p3185_p4  ;;  %s3012_s12 = scalar_lea.vmem %s3011_s24, 256 }
  0x1f   : > { %2698 = vmatprep.mubr.msk.f32.mxu0 %vm3087_vm0, %v3088_v11  ;;  %2709 = vmatprep.mubr.msk.f32.mxu1 %vm3087_vm0, %v3088_v11  ;;  %v2927_v6 = vpack.c.bf16 %v2557_v2, %v2556_v1  ;;  %v2558_v9 = vld [vmem:[%s3611_s2 + $0x70] sm:$0xff]  ;;  %v2559_v10 = vld [vmem:[%s3611_s2 + $0x78] sm:$0xff]  ;;  %v2924_v12 = vpack.c.bf16 %v2552_v8, %v2551_v7  ;;  %v2496_v14 = vld [vmem:[%s3616_s7] ss:$0 sm:$0xff]  ;;  %p3014_p2 = scmp.lt.s32.totalorder %s3012_s12, %s3006_s20 }
  0x20   : > { %v2930_v13 = vpack.c.bf16 %v2559_v10, %v2558_v9  ;;  %v2503_v21 = vld [vmem:[%s3614_s5 + $0x1] ss:$0 sm:$0xff]  ;;  %v2517_v30 = vld [vmem:[%s3614_s5 + $0x2] ss:$0 sm:$0xff]  ;;  %v2531_v39 = vld [vmem:[%s3614_s5 + $0x3] ss:$0 sm:$0xff]  ;;  %p3009_p0 = pneg %p3008_p13 }
  0x21   : > { %2877 = vmatpush3.bf16.msra.mxu0 %v2876_v25  ;;  %2883 = vmatpush3.bf16.msra.mxu1 %v2882_v26  ;;  %v2510_v22 = vld [vmem:[%s3616_s7 + $0x1] ss:$0 sm:$0xff]  ;;  %v2538_v40 = vld [vmem:[%s3616_s7 + $0x3] ss:$0 sm:$0xff]  ;;  %v2540_v47 = vld [vmem:[%s3612_s3] ss:$0 sm:$0xff]  ;;  %p3015_p3 = por %p3014_p2, %p3013_p1 }
  0x22   : > { %2884 = vmatprep.subr.bf16.mxu0 %v3086_v3  ;;  %2890 = vmatprep.subr.bf16.mxu1 %v3086_v3  ;;  %v2547_v48 = vld [vmem:[%s3612_s3 + $0x1] ss:$0 sm:$0xff] }
  0x23   : > { %p3016_p5 = pnand %p3015_p3, %p3009_p0 }
  0x24   : > { %2699 = vmatmul.mubr.msk.f32.vlgmr.msra.gmra.mrb[2].mxu0 %vm413_vm1, %v3254_v18  ;;  %2710 = vmatmul.mubr.msk.f32.vlgmr.msra.gmra.mrb[2].mxu1 %vm413_vm1, %v3254_v18 }
  0x25   : > { %2886 = vmatpush3.bf16.msra.mxu0 %v2885_v31  ;;  %2892 = vmatpush3.bf16.msra.mxu1 %v2891_v32  ;;  %v2524_v31 = vld [vmem:[%s3616_s7 + $0x2] ss:$0 sm:$0xff] }
  0x26   : > { %2887 = vmatprep.subr.bf16.mxu0 %v3086_v3  ;;  %2893 = vmatprep.subr.bf16.mxu1 %v3086_v3 }
  0x27   : > { %2720 = vmatprep.mubr.msk.f32.mxu0 %vm3087_vm0, %v3088_v11  ;;  %2731 = vmatprep.mubr.msk.f32.mxu1 %vm3087_vm0, %v3088_v11 }
  0x29   : > { %2889 = vmatpush3.bf16.msra.mxu0 %v2888_v37  ;;  %2895 = vmatpush3.bf16.msra.mxu1 %v2894_v38 }
  0x2a   : > { %2896 = vmatprep.subr.bf16.mxu0 %v3086_v3  ;;  %2902 = vmatprep.subr.bf16.mxu1 %v3086_v3 }
  0x2c   : > { %2721 = vmatmul.mubr.msk.f32.vlgmr.msra.gmra.mrb[4].mxu0 %vm413_vm1, %v3254_v18  ;;  %2732 = vmatmul.mubr.msk.f32.vlgmr.msra.gmra.mrb[4].mxu1 %vm413_vm1, %v3254_v18 }
  0x2d   : > { %2898 = vmatpush3.bf16.msra.mxu0 %v2897_v43  ;;  %2904 = vmatpush3.bf16.msra.mxu1 %v2903_v44 }
  0x2e   : > { %2899 = vmatprep.subr.bf16.mxu0 %v3086_v3  ;;  %2905 = vmatprep.subr.bf16.mxu1 %v3086_v3 }
  0x2f   : > { %2742 = vmatprep.mubr.msk.f32.mxu0 %vm3087_vm0, %v3088_v11  ;;  %2753 = vmatprep.mubr.msk.f32.mxu1 %vm3087_vm0, %v3088_v11 }
  0x31   : > { %2901 = vmatpush3.bf16.msra.mxu0 %v2900_v49  ;;  %2907 = vmatpush3.bf16.msra.mxu1 %v2906_v50 }
  0x32   : > { %2908 = vmatprep.subr.bf16.mxu0 %v3086_v3  ;;  %2914 = vmatprep.subr.bf16.mxu1 %v3086_v3 }
  0x34   : > { %2743 = vmatmul.mubr.msk.f32.vlgmr.msra.gmra.mrb[6].mxu0 %vm413_vm1, %v3254_v18  ;;  %2754 = vmatmul.mubr.msk.f32.vlgmr.msra.gmra.mrb[6].mxu1 %vm413_vm1, %v3254_v18 }
  0x35   : > { %2910 = vmatpush3.bf16.msra.mxu0 %v2909_v55  ;;  %2916 = vmatpush3.bf16.msra.mxu1 %v2915_v56  ;;  %v2554_v55 = vld [vmem:[%s3612_s3 + $0x2] ss:$0 sm:$0xff]  ;;  %v2561_v56 = vld [vmem:[%s3612_s3 + $0x3] ss:$0 sm:$0xff] }
  0x36   : > { %2911 = vmatprep.subr.bf16.mxu0 %v3086_v3  ;;  %2917 = vmatprep.subr.bf16.mxu1 %v3086_v3 }
  0x37   : > { %2764 = vmatprep.mubr.msk.f32.mxu0 %vm3087_vm0, %v3088_v11  ;;  %2775 = vmatprep.mubr.msk.f32.mxu1 %vm3087_vm0, %v3088_v11 }
  0x39   : > { %2913 = vmatpush3.bf16.msra.mxu0 %v2912_v61  ;;  %2919 = vmatpush3.bf16.msra.mxu1 %v2918_v62 }
  0x3a   : > { %2920 = vmatprep.subr.bf16.mxu0 %v3086_v3  ;;  %2926 = vmatprep.subr.bf16.mxu1 %v3086_v3 }
  0x3c   : > { %2765 = vmatmul.mubr.msk.f32.vlgmr.msra.gmra.mrb[8].mxu0 %vm413_vm1, %v1081_v4  ;;  %2776 = vmatmul.mubr.msk.f32.vlgmr.msra.gmra.mrb[8].mxu1 %vm413_vm1, %v1081_v4 }
  0x3d   : > { %2922 = vmatpush3.bf16.msra.mxu0 %v2921_v5  ;;  %2928 = vmatpush3.bf16.msra.mxu1 %v2927_v6 }
  0x3e   : > { %2923 = vmatprep.subr.bf16.mxu0 %v3086_v3  ;;  %2929 = vmatprep.subr.bf16.mxu1 %v3086_v3  ;;  %v2494_v3 = vld [vmem:[%s3614_s5] ss:$0 sm:$0xff] }
  0x3f   : > { %2786 = vmatprep.mubr.msk.f32.mxu0 %vm3087_vm0, %v3088_v11  ;;  %2797 = vmatprep.mubr.msk.f32.mxu1 %vm3087_vm0, %v3088_v11 }
  0x41   : > { %2925 = vmatpush3.bf16.msra.mxu0 %v2924_v12  ;;  %2931 = vmatpush3.bf16.msra.mxu1 %v2930_v13 }
  0x42   : > { %2800 = vmatprep.subr.mxu0 %v3088_v11  ;;  %2805 = vmatprep.subr.mxu1 %v3088_v11 }
  0x44   : > { %2787 = vmatmul.mubr.msk.f32.vlgmr.msra.gmra.mrb[10].mxu0 %vm413_vm1, %v1081_v4  ;;  %2798 = vmatmul.mubr.msk.f32.vlgmr.msra.gmra.mrb[10].mxu1 %vm413_vm1, %v1081_v4 }
  0x45   : > { %2802 = vmatprep.mubr.msk.f32.mxu0 %vm3087_vm0, %v3088_v11  ;;  %2807 = vmatprep.mubr.msk.f32.mxu1 %vm3087_vm0, %v3088_v11 }
  0xef   : > { %v483_v15 = vpop.f32.mrb[0].mxu0  ;;  %v566_v18 = vpop.f32.mrb[0].mxu1 }
  0xf0   : > { %v484_v16 = vadd.f32 %v2494_v3, %v483_v15  ;;  %v2678_v17 = vpop.f32.mrb[1].mxu0  ;;  %v567_v19 = vadd.f32 %v2496_v14, %v566_v18  ;;  %v2689_v20 = vpop.f32.mrb[1].mxu1 }
  0xf2   : > { %488 = vst.msk [vmem:[#allocation3] sm:$0xff] %vm487_vm2, %v484_v16  ;;  %570 = vst.msk [vmem:[#allocation4] sm:$0xff] %vm487_vm2, %v567_v19 }
  0xf7   : > { %v650_v23 = vpop.f32.mrb[2].mxu0  ;;  %v735_v26 = vpop.f32.mrb[2].mxu1 }
  0xf8   : > { %v651_v24 = vadd.f32 %v2503_v21, %v650_v23  ;;  %v2700_v25 = vpop.f32.mrb[3].mxu0  ;;  %v736_v27 = vadd.f32 %v2510_v22, %v735_v26  ;;  %v2711_v29 = vpop.f32.mrb[3].mxu1 }
  0xf9   : > { %v1428_v28 = vld [vmem:[#allocation3] sm:$0xff] }
  0xfa   : > { %655 = vst.msk [vmem:[#allocation3 + $0x8] sm:$0xff] %vm487_vm2, %v651_v24  ;;  %2801 = vmatpush3.xpose.msk.msra.mxu0 %vm487_vm2, %v1428_v28  ;;  %740 = vst.msk [vmem:[#allocation4 + $0x8] sm:$0xff] %vm487_vm2, %v736_v27  ;;  %v1432_v6 = vld [vmem:[#allocation4] sm:$0xff] }
  0xfb   : > { %2810 = vmatprep.subr.mxu0 %v3088_v11 }
  0xff   : > { %v820_v32 = vpop.f32.mrb[4].mxu0  ;;  %v905_v35 = vpop.f32.mrb[4].mxu1 }
 0x100   : > { %v821_v33 = vadd.f32 %v2517_v30, %v820_v32  ;;  %v2722_v34 = vpop.f32.mrb[5].mxu0  ;;  %v906_v36 = vadd.f32 %v2524_v31, %v905_v35  ;;  %v2733_v38 = vpop.f32.mrb[5].mxu1 }
 0x101   : > { %v1429_v37 = vld [vmem:[#allocation3 + $0x8] sm:$0xff] }
 0x102   : > { %825 = vst.msk [vmem:[#allocation3 + $0x10] sm:$0xff] %vm487_vm2, %v821_v33  ;;  %2806 = vmatpush3.xpose.msk.msra.mxu1 %vm487_vm2, %v1429_v37  ;;  %910 = vst.msk [vmem:[#allocation4 + $0x10] sm:$0xff] %vm487_vm2, %v906_v36  ;;  %v1433_v7 = vld [vmem:[#allocation4 + $0x8] sm:$0xff] }
 0x103   : > { %2815 = vmatprep.subr.mxu1 %v3088_v11 }
 0x107   : > { %v990_v41 = vpop.f32.mrb[6].mxu0  ;;  %v1075_v44 = vpop.f32.mrb[6].mxu1 }
 0x108   : > { %v991_v42 = vadd.f32 %v2531_v39, %v990_v41  ;;  %v2744_v43 = vpop.f32.mrb[7].mxu0  ;;  %v1076_v45 = vadd.f32 %v2538_v40, %v1075_v44  ;;  %v2755_v46 = vpop.f32.mrb[7].mxu1 }
 0x109   : > { %v1430_v1 = vld [vmem:[#allocation3 + $0x10] sm:$0xff] }
 0x10a   : > { %995 = vst.msk [vmem:[#allocation3 + $0x18] sm:$0xff] %vm487_vm2, %v991_v42  ;;  %1080 = vst.msk [vmem:[#allocation4 + $0x18] sm:$0xff] %vm487_vm2, %v1076_v45  ;;  %v1434_v46 = vld [vmem:[#allocation4 + $0x10] sm:$0xff] }
 0x10f   : > { %v1163_v49 = vpop.f32.mrb[8].mxu0  ;;  %v1248_v51 = vpop.f32.mrb[8].mxu1 }
 0x110   : > { %v1164_v50 = vadd.f32 %v2540_v47, %v1163_v49  ;;  %v2766_v52 = vpop.f32.mrb[9].mxu0  ;;  %v1249_v53 = vadd.f32 %v2547_v48, %v1248_v51  ;;  %v2777_v54 = vpop.f32.mrb[9].mxu1 }
 0x111   : > { %v1431_v2 = vld [vmem:[#allocation3 + $0x18] sm:$0xff]  ;;  %v2076_v54 = vld [vmem:[%s3617_s8] sm:$0xff] }
 0x112   : > { %1168 = vst.msk [vmem:[#allocation2] sm:$0xff] %vm487_vm2, %v1164_v50  ;;  %1253 = vst.msk [vmem:[#allocation2 + $0x8] sm:$0xff] %vm487_vm2, %v1249_v53  ;;  %v1435_v49 = vld [vmem:[#allocation4 + $0x18] sm:$0xff] }
 0x117   : > { %v1333_v57 = vpop.f32.mrb[10].mxu0  ;;  %v1418_v59 = vpop.f32.mrb[10].mxu1 }
 0x118   : > { %v1334_v58 = vadd.f32 %v2554_v55, %v1333_v57  ;;  %v2788_v60 = vpop.f32.mrb[11].mxu0  ;;  %v1419_v61 = vadd.f32 %v2561_v56, %v1418_v59  ;;  %v2799_v63 = vpop.f32.mrb[11].mxu1  ;;  %v2077_v55 = vld [vmem:[%s3617_s8 + $0x8] sm:$0xff]  ;;  %v2078_v56 = vld [vmem:[%s3617_s8 + $0x10] sm:$0xff]  ;;  %v2079_v59 = vld [vmem:[%s3617_s8 + $0x18] sm:$0xff] }
 0x119   : > { %v1424_v62 = vld [vmem:[#allocation2] sm:$0xff]  ;;  %v1425_v0 = vld [vmem:[#allocation2 + $0x8] sm:$0xff] }
 0x11a   : > { %1338 = vst.msk [vmem:[#allocation2 + $0x10] sm:$0xff] %vm487_vm2, %v1334_v58  ;;  %2803 = vmatmul.mubr.msk.f32.vlgmr.msra.gmra.mrb[12].mxu0 %vm487_vm2, %v1424_v62  ;;  %1423 = vst.msk [vmem:[#allocation2 + $0x18] sm:$0xff] %vm487_vm2, %v1419_v61  ;;  %2808 = vmatmul.mubr.msk.f32.vlgmr.msra.gmra.mrb[12].mxu1 %vm487_vm2, %v1425_v0 }
 0x11b   : > { %2811 = vmatpush3.xpose.msk.msra.mxu0 %vm487_vm2, %v1430_v1  ;;  %2816 = vmatpush3.xpose.msk.msra.mxu1 %vm487_vm2, %v1431_v2 }
 0x11c   : > { %2812 = vmatprep.mubr.msk.f32.mxu0 %vm3087_vm0, %v3088_v11  ;;  %2817 = vmatprep.mubr.msk.f32.mxu1 %vm3087_vm0, %v3088_v11 }
 0x11d   : > { %2820 = vmatprep.subr.mxu0 %v3088_v11  ;;  %2825 = vmatprep.subr.mxu1 %v3088_v11 }
 0x121   : > { %v1426_v4 = vld [vmem:[#allocation2 + $0x10] sm:$0xff]  ;;  %v1427_v5 = vld [vmem:[#allocation2 + $0x18] sm:$0xff] }
 0x122   : > { %2813 = vmatmul.mubr.msk.f32.vlgmr.msra.gmra.mrb[14].mxu0 %vm487_vm2, %v1426_v4  ;;  %2818 = vmatmul.mubr.msk.f32.vlgmr.msra.gmra.mrb[14].mxu1 %vm487_vm2, %v1427_v5 }
 0x123   : > { %2821 = vmatpush3.msra.mxu0 %v1432_v6  ;;  %2826 = vmatpush3.msra.mxu1 %v1433_v7 }
 0x124   : > { %2822 = vmatprep.mubr.msk.f32.mxu0 %vm3087_vm0, %v3088_v11  ;;  %2830 = vmatprep.subr.mxu0 %v3088_v11 }
 0x125   : > { %2827 = vmatprep.mubr.msk.f32.mxu1 %vm3087_vm0, %v3088_v11  ;;  %2835 = vmatprep.subr.mxu1 %v3088_v11 }
 0x1ed   : > { %v1508_v8 = vpop.f32.mrb[12].mxu0  ;;  %v1584_v12 = vpop.f32.mrb[12].mxu1 }
 0x1ee   : > { %v2804_v9 = vpop.f32.mrb[13].mxu0  ;;  %v1740_v10 = vsel %vm487_vm2, %v1508_v8, -inf  ;;  %v2809_v13 = vpop.f32.mrb[13].mxu1  ;;  %v1743_v3 = vsel %vm487_vm2, %v1584_v12, -inf }
 0x1ef   : > { %1741 = vmax.xlane.f32.xlu0 %v1740_v10 }
 0x1f3   : > { %1744 = vmax.xlane.f32.xlu0 %v1743_v3 }
 0x1f5   : > { %v1660_v14 = vpop.f32.mrb[14].mxu0  ;;  %v1736_v17 = vpop.f32.mrb[14].mxu1 }
 0x1f6   : > { %v2814_v15 = vpop.f32.mrb[15].mxu0  ;;  %v1746_v16 = vsel %vm487_vm2, %v1660_v14, -inf  ;;  %v2819_v18 = vpop.f32.mrb[15].mxu1  ;;  %v1749_v19 = vsel %vm487_vm2, %v1736_v17, -inf }
 0x1f7   : > { %1747 = vmax.xlane.f32.xlu1 %v1746_v16  ;;  %v2579_v15 = vld [vmem:[%s3618_s9] ss:$0 sm:$0xff] }
 0x1fb   : > { %1750 = vmax.xlane.f32.xlu1 %v1749_v19 }
 0x27c   : > { %v1742_v20 = vpop.xlane.xlu0 %1741 }
 0x27d   : > { %v1752_v21 = vsub.f32 %v1508_v8, %v1742_v20 }
 0x27f   : > { %v1756_v22 = vmul.f32 1.442695, %v1752_v21 }
 0x280   : > { %v1745_v23 = vpop.xlane.xlu0 %1744 }
 0x281   : > { %2990 = vpow2.f32 %v1756_v22  ;;  %v1753_v24 = vsub.f32 %v1584_v12, %v1745_v23 }
 0x283   : > { %v1758_v25 = vmul.f32 1.442695, %v1753_v24 }
 0x284   : > { %v1748_v26 = vpop.xlane.xlu1 %1747 }
 0x285   : > { %2992 = vpow2.f32 %v1758_v25  ;;  %v1754_v27 = vsub.f32 %v1660_v14, %v1748_v26 }
 0x287   : > { %v1760_v28 = vmul.f32 1.442695, %v1754_v27 }
 0x288   : > { %v1751_v29 = vpop.xlane.xlu1 %1750 }
 0x289   : > { %2994 = vpow2.f32 %v1760_v28  ;;  %v1755_v30 = vsub.f32 %v1736_v17, %v1751_v29 }
 0x28b   : > { %v2991_v31 = vpop.eup %2990  ;;  %v1762_v32 = vmul.f32 1.442695, %v1755_v30 }
 0x28c   : > { %v1764_v33 = vsel %vm487_vm2, %v2991_v31, 0.0 }
 0x28d   : > { %2996 = vpow2.f32 %v1762_v32  ;;  %1765 = vadd.xlane.f32.xlu0 %v1764_v33 }
 0x28f   : > { %v2993_v34 = vpop.eup %2992 }
 0x290   : > { %v1767_v35 = vsel %vm487_vm2, %v2993_v34, 0.0 }
 0x291   : > { %1768 = vadd.xlane.f32.xlu1 %v1767_v35 }
 0x293   : > { %v2995_v36 = vpop.eup %2994 }
 0x294   : > { %v1770_v37 = vsel %vm487_vm2, %v2995_v36, 0.0 }
 0x295   : > { %1771 = vadd.xlane.f32.xlu0 %v1770_v37 }
 0x297   : > { %v2997_v38 = vpop.eup %2996 }
 0x298   : > { %v1773_v39 = vsel %vm487_vm2, %v2997_v38, 0.0 }
 0x299   : > { %1774 = vadd.xlane.f32.xlu1 %v1773_v39 }
 0x31a   : > { %v1766_v40 = vpop.xlane.xlu0 %1765 }
 0x31b   : > { %2998 = vrcp.f32 %v1766_v40 }
 0x31e   : > { %v1769_v41 = vpop.xlane.xlu1 %1768 }
 0x31f   : > { %3000 = vrcp.f32 %v1769_v41 }
 0x322   : > { %v1772_v42 = vpop.xlane.xlu0 %1771 }
 0x323   : > { %3002 = vrcp.f32 %v1772_v42 }
 0x325   : > { %v2999_v43 = vpop.eup %2998 }
 0x326   : > { %v1780_v44 = vmul.f32 %v2999_v43, %v2991_v31  ;;  %v1775_v45 = vpop.xlane.xlu1 %1774 }
 0x327   : > { %3004 = vrcp.f32 %v1775_v45 }
 0x328   : > { %2823 = vmatmul.mubr.msk.f32.vlgmr.msra.gmra.mrb[16].mxu0 %vm487_vm2, %v1780_v44 }
 0x329   : > { %v3001_v47 = vpop.eup %3000  ;;  %2831 = vmatpush3.msra.mxu0 %v1434_v46  ;;  %2832 = vmatprep.mubr.msk.f32.mxu0 %vm3087_vm0, %v3088_v11 }
 0x32a   : > { %v1781_v48 = vmul.f32 %v3001_v47, %v2993_v34  ;;  %2840 = vmatprep.subr.mxu0 %v3088_v11 }
 0x32c   : > { %2828 = vmatmul.mubr.msk.f32.vlgmr.msra.gmra.mrb[16].mxu1 %vm487_vm2, %v1781_v48 }
 0x32d   : > { %v3003_v50 = vpop.eup %3002  ;;  %2836 = vmatpush3.msra.mxu1 %v1435_v49  ;;  %2837 = vmatprep.mubr.msk.f32.mxu1 %vm3087_vm0, %v3088_v11 }
 0x32e   : > { %v1782_v51 = vmul.f32 %v3003_v50, %v2995_v36  ;;  %2845 = vmatprep.subr.mxu1 %v3088_v11 }
 0x330   : > { %2833 = vmatmul.mubr.msk.f32.vlgmr.msra.gmra.mrb[18].mxu0 %vm487_vm2, %v1782_v51 }
 0x331   : > { %v3005_v52 = vpop.eup %3004  ;;  %2842 = vmatprep.mubr.msk.f32.mxu0 %vm3087_vm0, %v3088_v11  ;;  %2841 = vmatpush3.msra.mxu0 %v2076_v54 }
 0x332   : > { %v1783_v53 = vmul.f32 %v3005_v52, %v2997_v38  ;;  %2850 = vmatprep.subr.mxu0 %v3088_v11 }
 0x334   : > { %2838 = vmatmul.mubr.msk.f32.vlgmr.msra.gmra.mrb[18].mxu1 %vm487_vm2, %v1783_v53 }
 0x335   : > { %2847 = vmatprep.mubr.msk.f32.mxu1 %vm3087_vm0, %v3088_v11  ;;  %2846 = vmatpush3.msra.mxu1 %v2077_v55 }
 0x336   : > { %2855 = vmatprep.subr.mxu1 %v3088_v11 }
 0x3fb   : > { %v1853_v57 = vpop.f32.mrb[16].mxu0 }
 0x3fc   : > { %v2824_v58 = vpop.f32.mrb[17].mxu0  ;;  %2843 = vmatmul.mubr.msk.f32.vlgmr.msra.gmra.mrb[20].mxu0 %vm487_vm2, %v1853_v57 }
 0x3fd   : > { %2851 = vmatpush3.msra.mxu0 %v2078_v56  ;;  %2852 = vmatprep.mubr.msk.f32.mxu0 %vm3087_vm0, %v3088_v11 }
 0x3ff   : > { %v1926_v60 = vpop.f32.mrb[16].mxu1 }
 0x400   : > { %v2829_v61 = vpop.f32.mrb[17].mxu1  ;;  %2848 = vmatmul.mubr.msk.f32.vlgmr.msra.gmra.mrb[20].mxu1 %vm487_vm2, %v1926_v60 }
 0x401   : > { %2856 = vmatpush3.msra.mxu1 %v2079_v59  ;;  %2857 = vmatprep.mubr.msk.f32.mxu1 %vm3087_vm0, %v3088_v11 }
 0x403   : > { %v1999_v62 = vpop.f32.mrb[18].mxu0 }
 0x404   : > { %v2834_v63 = vpop.f32.mrb[19].mxu0  ;;  %2853 = vmatmul.mubr.msk.f32.vlgmr.msra.gmra.mrb[22].mxu0 %vm487_vm2, %v1999_v62 }
 0x407   : > { %v2072_v0 = vpop.f32.mrb[18].mxu1 }
 0x408   : > { %v2839_v1 = vpop.f32.mrb[19].mxu1  ;;  %2858 = vmatmul.mubr.msk.f32.vlgmr.msra.gmra.mrb[22].mxu1 %vm487_vm2, %v2072_v0 }
 0x4cf   : > { %v2149_v2 = vpop.f32.mrb[20].mxu0 }
 0x4d0   : > { %v2844_v4 = vpop.f32.mrb[21].mxu0  ;;  %v2372_v6 = vsel %vm413_vm1, %v2149_v2, 0.0 }
 0x4d3   : > { %v2222_v5 = vpop.f32.mrb[20].mxu1 }
 0x4d4   : > { %v2373_v7 = vsel %vm413_vm1, %v2222_v5, 0.0  ;;  %v2849_v8 = vpop.f32.mrb[21].mxu1 }
 0x4d5   : > { %v2374_v9 = vadd.f32 %v2373_v7, %v2372_v6 }
 0x4d7   : > { %v2295_v11 = vpop.f32.mrb[22].mxu0 }
 0x4d8   : > { %v2375_v10 = vsel %vm413_vm1, %v2295_v11, 0.0  ;;  %v2854_v12 = vpop.f32.mrb[23].mxu0 }
 0x4d9   : > { %v2376_v13 = vadd.f32 %v2375_v10, %v2374_v9 }
 0x4db   : > { %v2368_v3 = vpop.f32.mrb[22].mxu1 }
 0x4dc   : > { %v2377_v14 = vsel %vm413_vm1, %v2368_v3, 0.0  ;;  %v2859_v16 = vpop.f32.mrb[23].mxu1 }
 0x4dd   : > { %v2378_v17 = vadd.f32 %v2377_v14, %v2376_v13 }
 0x4df   : > { %v2386_v18 = vadd.f32 %v2579_v15, %v2378_v17 }
 0x4e1   : > { %2387 = vst.msk [vmem:[%s385_s17] sm:$0xff] %vm413_vm1, %v2386_v18 }
 0x4e2   : > { %3019 = shalt.err (!%p3016_p5)
}
 0x4e3   : > { %s3020_s22 = scalar_lea.hbm %s3561_s30, 128  ;;  %s3024_s17 = scalar_lea.hbm %s3619_s10, 256 }
 0x4e4   : > { %p3021_p6 = scmp.ne.s32.totalorder %s3561_s30, %s3020_s22  ;;  %p3025_p10 = scmp.lt.u32.totalorder %s3561_s30, %s3619_s10 }
 0x4e5   : > { %p3026_p11 = scmp.lt.u32.totalorder %s3024_s17, %s3020_s22  ;;  %p3028_p13 = scmp.lt.u32.totalorder %s3020_s22, %s3561_s30 }
 0x4e6   : > { %p3022_p7 = pnand %p3021_p6, %p3185_p4 }
 0x4e7   : > { %p3027_p12 = por %p3026_p11, %p3025_p10 }
 0x4e8   : > { %p3023_p9 = pneg %p3022_p7 }
 0x4e9   : > { %p3029_p0 = por %p3028_p13, %p3027_p12 }
 0x4eb   : > { %p3030_p1 = pnand %p3029_p0, %p3023_p9 }
 0x4ed   : > { %3033 = shalt.err (!%p3030_p1)
}
 0x4ee   : > { %2932 = dma.vmem_to_hbm [thread:$0]  (%p3185_p4), %s3563_s19, 128, %s3561_s30, %s2389_s11  }
 0x4ef PF: > { %p2938_p2 = scmp.ge.s32.totalorder %s3084_s18, 2  ;;  %s2415_s20 = sand.u32 1, %s3064_s13  }
 0x4f0   : > { %s2416_s16 = scalar_lea.sflag [#allocation6], %s2415_s20 }
 0x4f1   : > { %p2935_p3 = pnand %p2938_p2, %p3192_p8 }
 0x4f3   : > { %3059 = dma.done.wait (!%p2935_p3), %s2416_s16, 128  }
 0x4f4   : > { %3061 = vsyncadd (!%p2935_p3), %s2416_s16, 4294967168  ;;  %s23_s18 = sadd.s32 1, %s3084_s18   ;;  %s3626_s16 = sld [smem:[#allocation8_spill]] }
 0x4f5   : > { %p20_p5 = scmp.ge.s32.totalorder %s23_s18, 4   ;;  %s3627_s17 = sld [smem:[#allocation9_spill]] }
 0x4f6   : > { %s3628_s13 = smov %s3068_s14  ;;  %s3629_s14 = smov %s3072_s15 }
 0x4f7   : > { %s3630_s15 = smov %s3198_s26  ;;  %22 = sbr.rel (!%p20_p5) target bundleno = 4 (0x4), region = 129 }
 0x4fe   :  { %2421 = vsyncpa [#allocation6], 1 }
 0x4ff   :  { %2423 = vsyncpa [#allocation6 + $0x1], 1 }

</bundles_post_ra>
